<compile_context>
chip_gen: v7x
topology: tpu7x:2x2x1
jax: 0.10.0
libtpu: 0.0.40
codegen_flags: <defaults>
</compile_context>

<pallas_src>
import functools

import jax
import jax.numpy as jnp
from jax import lax
from jax.experimental import pallas as pl
from jax.experimental.pallas import tpu as pltpu


def _make_pe_table(d_model: int, max_len: int) -> jnp.ndarray:
    """Precompute the (max_len, 1, d_model) sinusoidal table (plain JAX glue)."""
    position = jnp.arange(max_len, dtype=jnp.float32)[:, None]          # (L, 1)
    div_term = jnp.exp(
        jnp.arange(0, d_model, 2, dtype=jnp.float32)
        * (-jnp.log(jnp.float32(10000.0)) / d_model)
    )                                                                    # (D/2,)
    pe = jnp.zeros((max_len, d_model), dtype=jnp.float32)
    pe = pe.at[:, 0::2].set(jnp.sin(position * div_term))
    pe = pe.at[:, 1::2].set(jnp.cos(position * div_term))
    return pe[:, None, :]                                                # (L, 1, D)


def _fmix32(x):
    """murmur3 32-bit finalizer (uint32 in, uint32 out) — plain VPU integer ops."""
    x = x ^ (x >> 16)
    x = x * jnp.uint32(0x85EBCA6B)
    x = x ^ (x >> 13)
    x = x * jnp.uint32(0xC2B2AE35)
    x = x ^ (x >> 16)
    return x


def _pe_dropout_kernel(seed_ref, x_ref, pe_ref, sid_ref, o_ref, *, p: float):
    # x_ref/o_ref: (TS, B, D); pe_ref: (TS, 1, D); sid_ref: (TS, 1, 1) int32.
    _, B, D = x_ref.shape

    # Broadcast-add of the PE row (middle dim 1 -> B, sublane broadcast).
    y = x_ref[...].astype(jnp.float32) + pe_ref[...]

    # ---- stateless dropout: counter-based hash on the global element id ----
    # Seed-derived key (scalar, SMEM read).
    key = _fmix32(seed_ref[0].astype(jnp.uint32) * jnp.uint32(0x9E3779B1)
                  + jnp.uint32(0x85EBCA77))
    # Per-element global index: iotas only along the last two (tiled) dims; the
    # sequence index comes in as data so results are independent of tile size.
    b_idx = lax.broadcasted_iota(jnp.int32, y.shape, 1)
    d_idx = lax.broadcasted_iota(jnp.int32, y.shape, 2)
    gid = (sid_ref[...] * B + b_idx) * D + d_idx            # (TS, B, D)
    bits = _fmix32(gid.astype(jnp.uint32) ^ key)
    # Integer-domain keep decision: P(drop) = thresh / 2^31 = p.
    bits31 = (bits & jnp.uint32(0x7FFFFFFF)).astype(jnp.int32)
    thresh = jnp.int32(min(max(int(round(p * (1 << 31))), 1), (1 << 31) - 1))
    keep = bits31 >= thresh
    scale = jnp.float32(1.0 / (1.0 - p))
    y = jnp.where(keep, y * scale, jnp.float32(0.0))

    o_ref[...] = y.astype(o_ref.dtype)


_TARGET_BLOCK_BYTES = 2 * 1024 * 1024   # ~2 MiB x-tile -> near HBM roofline


def _pick_block_rows(S: int, B: int, D: int, itemsize: int) -> int:
    rows = max(1, _TARGET_BLOCK_BYTES // (B * D * itemsize))
    rows = min(S, rows)
    if rows < S and rows > 8:
        rows = (rows // 8) * 8          # sublane-friendly DMA shape
    return rows


def positional_encoding_forward(
    x: jnp.ndarray,
    pe_table: jnp.ndarray,
    *,
    p: float = 0.1,
    training: bool = True,
    seed: int = 0,
    block_rows: int | None = None,
) -> jnp.ndarray:
    """x: (S, B, D).  Returns dropout(x + pe[:S]) with PyTorch dropout semantics."""
    S, B, D = x.shape
    pe3 = pe_table[:S].astype(jnp.float32)              # (S, 1, D)

    # Dropout disabled: plain XLA broadcast-add is already at HBM roofline —
    # skip the kernel launch + scalar prefetch entirely.
    if (not training) or p <= 0.0:
        return (x.astype(jnp.float32) + pe3).astype(x.dtype)
    if p >= 1.0:                                          # PyTorch: all zeros
        return jnp.zeros_like(x)

    ts = block_rows if block_rows is not None else _pick_block_rows(
        S, B, D, x.dtype.itemsize)
    seed_arr = jnp.array([seed], dtype=jnp.int32)
    seq_ids = jnp.arange(S, dtype=jnp.int32).reshape(S, 1, 1)

    kernel = functools.partial(_pe_dropout_kernel, p=float(p))

    grid_spec = pltpu.PrefetchScalarGridSpec(
        num_scalar_prefetch=1,                            # seed -> SMEM
        grid=(pl.cdiv(S, ts),),
        in_specs=[
            pl.BlockSpec((ts, B, D), lambda i, seed: (i, 0, 0)),   # x
            pl.BlockSpec((ts, 1, D), lambda i, seed: (i, 0, 0)),   # pe slice
            pl.BlockSpec((ts, 1, 1), lambda i, seed: (i, 0, 0)),   # seq ids
        ],
        out_specs=pl.BlockSpec((ts, B, D), lambda i, seed: (i, 0, 0)),
    )

    return pl.pallas_call(
        kernel,
        out_shape=jax.ShapeDtypeStruct((S, B, D), x.dtype),
        grid_spec=grid_spec,
        compiler_params=pltpu.CompilerParams(
            dimension_semantics=("parallel",),            # stateless RNG -> megacore-safe
            vmem_limit_bytes=32 * 1024 * 1024,            # fits v7x's 64 MiB VMEM
        ),
    )(seed_arr, x, pe3, seq_ids)


if __name__ == "__main__":
    d_model = 32
    max_len = 64
    seq_len = 8
    batch = 2
    p = 0.1

    key = jax.random.PRNGKey(0)
    x = jax.random.normal(key, (seq_len, batch, d_model), dtype=jnp.float32)
    pe_table = _make_pe_table(d_model, max_len)
    ref = x + pe_table[:seq_len]

    # Eval mode (dropout identity): handled by the XLA fast path.
    out_eval = positional_encoding_forward(x, pe_table, p=p, training=False)
    jax.block_until_ready(out_eval)
    assert jnp.allclose(out_eval, ref, atol=1e-6), "eval-mode mismatch"

    # Training mode: exercises the Pallas kernel (add + dropout).
    out_train = positional_encoding_forward(x, pe_table, p=p, training=True, seed=0)
    out_train = jax.block_until_ready(out_train)
    assert out_train.shape == (seq_len, batch, d_model)

    # Structural check: every element is either dropped (exact 0) or equals
    # (x + pe) / (1 - p); this validates both the add and the dropout scaling.
    scaled = ref / (1.0 - p)
    is_drop = jnp.abs(out_train) <= 1e-6
    is_keep = jnp.abs(out_train - scaled) <= 1e-4
    assert bool(jnp.all(is_drop | is_keep)), "training-mode values malformed"
    keep_frac = float(jnp.mean(is_keep.astype(jnp.float32)))
    assert 0.75 <= keep_frac <= 0.98, f"implausible keep fraction {keep_frac}"

    print("KERNEL_OK")
</pallas_src>

<mosaic_0001>
module attributes {stable_mosaic.version = 11 : i64} {
  func.func @_pe_dropout_kernel(%arg0: i32, %arg1: memref<1xi32, #tpu.memory_space<smem>>, %arg2: memref<8x2x32xf32, #tpu.memory_space<vmem>>, %arg3: memref<8x1x32xf32, #tpu.memory_space<vmem>>, %arg4: memref<8x1x1xi32, #tpu.memory_space<vmem>>, %arg5: memref<8x2x32xf32, #tpu.memory_space<vmem>>) attributes {dimension_semantics = [#tpu.dimension_semantics<parallel>], iteration_bounds = array<i64: 1>, scalar_prefetch = 1 : i64, scratch_operands = 0 : i64, tpu.core_type = #tpu.core_type<tc>, window_params = [{transform_indices = @transform_0, window_bounds = array<i64: 8, 2, 32>}, {transform_indices = @transform_1, window_bounds = array<i64: 8, 1, 32>}, {transform_indices = @transform_2, window_bounds = array<i64: 8, 1, 1>}, {transform_indices = @transform_3, window_bounds = array<i64: 8, 2, 32>}]} {
    %c0 = arith.constant 0 : index
    %c0_0 = arith.constant 0 : index
    %c0_1 = arith.constant 0 : index
    %0 = vector.load %arg2[%c0, %c0_0, %c0_1] : memref<8x2x32xf32, #tpu.memory_space<vmem>>, vector<8x2x32xf32>
    %c0_2 = arith.constant 0 : index
    %c0_3 = arith.constant 0 : index
    %c0_4 = arith.constant 0 : index
    %1 = vector.load %arg3[%c0_2, %c0_3, %c0_4] : memref<8x1x32xf32, #tpu.memory_space<vmem>>, vector<8x1x32xf32>
    %2 = vector.broadcast %1 : vector<8x1x32xf32> to vector<8x2x32xf32>
    %3 = arith.addf %0, %2 : vector<8x2x32xf32>
    %c0_5 = arith.constant 0 : index
    %4 = memref.load %arg1[%c0_5] : memref<1xi32, #tpu.memory_space<smem>>
    %c-1640531535_i32 = arith.constant -1640531535 : i32
    %5 = arith.muli %4, %c-1640531535_i32 : i32
    %c-2048144777_i32 = arith.constant -2048144777 : i32
    %6 = arith.addi %5, %c-2048144777_i32 : i32
    %c16_i32 = arith.constant 16 : i32
    %7 = arith.shrui %6, %c16_i32 : i32
    %8 = arith.xori %6, %7 : i32
    %c-2048144789_i32 = arith.constant -2048144789 : i32
    %9 = arith.muli %8, %c-2048144789_i32 : i32
    %c13_i32 = arith.constant 13 : i32
    %10 = arith.shrui %9, %c13_i32 : i32
    %11 = arith.xori %9, %10 : i32
    %c-1028477387_i32 = arith.constant -1028477387 : i32
    %12 = arith.muli %11, %c-1028477387_i32 : i32
    %c16_i32_6 = arith.constant 16 : i32
    %13 = arith.shrui %12, %c16_i32_6 : i32
    %14 = arith.xori %12, %13 : i32
    %15 = tpu.iota {dimensions = array<i32: 1>} : vector<8x2x32xi32>
    %16 = tpu.iota {dimensions = array<i32: 2>} : vector<8x2x32xi32>
    %c0_7 = arith.constant 0 : index
    %c0_8 = arith.constant 0 : index
    %c0_9 = arith.constant 0 : index
    %17 = vector.load %arg4[%c0_7, %c0_8, %c0_9] : memref<8x1x1xi32, #tpu.memory_space<vmem>>, vector<8x1x1xi32>
    %c2_i32 = arith.constant 2 : i32
    %18 = vector.broadcast %c2_i32 : i32 to vector<8x1x1xi32>
    %19 = arith.muli %17, %18 : vector<8x1x1xi32>
    %20 = vector.broadcast %19 : vector<8x1x1xi32> to vector<8x2x32xi32>
    %21 = arith.addi %20, %15 : vector<8x2x32xi32>
    %c32_i32 = arith.constant 32 : i32
    %22 = vector.broadcast %c32_i32 : i32 to vector<8x2x32xi32>
    %23 = arith.muli %21, %22 : vector<8x2x32xi32>
    %24 = arith.addi %23, %16 : vector<8x2x32xi32>
    %25 = vector.broadcast %14 : i32 to vector<8x2x32xi32>
    %26 = arith.xori %24, %25 : vector<8x2x32xi32>
    %c16_i32_10 = arith.constant 16 : i32
    %27 = vector.broadcast %c16_i32_10 : i32 to vector<8x2x32xi32>
    %28 = arith.shrui %26, %27 : vector<8x2x32xi32>
    %29 = arith.xori %26, %28 : vector<8x2x32xi32>
    %c-2048144789_i32_11 = arith.constant -2048144789 : i32
    %30 = vector.broadcast %c-2048144789_i32_11 : i32 to vector<8x2x32xi32>
    %31 = arith.muli %29, %30 : vector<8x2x32xi32>
    %c13_i32_12 = arith.constant 13 : i32
    %32 = vector.broadcast %c13_i32_12 : i32 to vector<8x2x32xi32>
    %33 = arith.shrui %31, %32 : vector<8x2x32xi32>
    %34 = arith.xori %31, %33 : vector<8x2x32xi32>
    %c-1028477387_i32_13 = arith.constant -1028477387 : i32
    %35 = vector.broadcast %c-1028477387_i32_13 : i32 to vector<8x2x32xi32>
    %36 = arith.muli %34, %35 : vector<8x2x32xi32>
    %c16_i32_14 = arith.constant 16 : i32
    %37 = vector.broadcast %c16_i32_14 : i32 to vector<8x2x32xi32>
    %38 = arith.shrui %36, %37 : vector<8x2x32xi32>
    %39 = arith.xori %36, %38 : vector<8x2x32xi32>
    %c2147483647_i32 = arith.constant 2147483647 : i32
    %40 = vector.broadcast %c2147483647_i32 : i32 to vector<8x2x32xi32>
    %41 = arith.andi %39, %40 : vector<8x2x32xi32>
    %c214748365_i32 = arith.constant 214748365 : i32
    %42 = vector.broadcast %c214748365_i32 : i32 to vector<8x2x32xi32>
    %43 = arith.cmpi sge, %41, %42 : vector<8x2x32xi32>
    %cst = arith.constant 1.11111116 : f32
    %44 = vector.broadcast %cst : f32 to vector<8x2x32xf32>
    %45 = arith.mulf %3, %44 : vector<8x2x32xf32>
    %cst_15 = arith.constant 0.000000e+00 : f32
    %46 = vector.broadcast %cst_15 : f32 to vector<8x2x32xf32>
    %47 = arith.select %43, %45, %46 : vector<8x2x32xi1>, vector<8x2x32xf32>
    %c0_16 = arith.constant 0 : index
    %c0_17 = arith.constant 0 : index
    %c0_18 = arith.constant 0 : index
    %48 = vector.load %arg5[%c0_16, %c0_17, %c0_18] : memref<8x2x32xf32, #tpu.memory_space<vmem>>, vector<8x2x32xf32>
    tpu.vector_store %arg5[%c0_16, %c0_17, %c0_18], %47 {strides = array<i32>} : memref<8x2x32xf32, #tpu.memory_space<vmem>>, vector<8x2x32xf32>,
    return
  }
  func.func @transform_0(%arg0: i32, %arg1: memref<1xi32, #tpu.memory_space<smem>>) -> (i32, i32, i32) {
    %c0_i32 = arith.constant 0 : i32
    %c0_i32_0 = arith.constant 0 : i32
    %c0_i32_1 = arith.constant 0 : i32
    return %arg0, %c0_i32, %c0_i32_0 : i32, i32, i32
  }
  func.func @transform_1(%arg0: i32, %arg1: memref<1xi32, #tpu.memory_space<smem>>) -> (i32, i32, i32) {
    %c0_i32 = arith.constant 0 : i32
    %c0_i32_0 = arith.constant 0 : i32
    %c0_i32_1 = arith.constant 0 : i32
    return %arg0, %c0_i32, %c0_i32_0 : i32, i32, i32
  }
  func.func @transform_2(%arg0: i32, %arg1: memref<1xi32, #tpu.memory_space<smem>>) -> (i32, i32, i32) {
    %c0_i32 = arith.constant 0 : i32
    %c0_i32_0 = arith.constant 0 : i32
    %c0_i32_1 = arith.constant 0 : i32
    return %arg0, %c0_i32, %c0_i32_0 : i32, i32, i32
  }
  func.func @transform_3(%arg0: i32, %arg1: memref<1xi32, #tpu.memory_space<smem>>) -> (i32, i32, i32) {
    %c0_i32 = arith.constant 0 : i32
    %c0_i32_0 = arith.constant 0 : i32
    %c0_i32_1 = arith.constant 0 : i32
    return %arg0, %c0_i32, %c0_i32_0 : i32, i32, i32
  }
}

</mosaic_0001>

<bundles_post_ra>
// kernel: tpu_custom_call.1
= control target key start
LH: loop header
LB: loop body
LE: loop exit
PB: predicated region body
PF: predicated region fallthrough
CT: control target
= control target key end

     0   :  { %10 = vsyncpa [#allocation5], 0  ;;  %s576_s0 = inlined_call_operand.<no memory space> [shape: s32[1], index: 0, kind: input, shape index: {}]   ;;  %s577_s1 = inlined_call_operand.hbm [shape: f32[8,2,32], index: 1, kind: input, shape index: {}]   ;;  %s578_s2 = inlined_call_operand.vmem [shape: f32[8,1,32], index: 2, kind: input, shape index: {}]   ;;  %s579_s3 = inlined_call_operand.vmem [shape: s32[8,1,1], index: 3, kind: input, shape index: {}]   ;;  %s580_s4 = inlined_call_operand.hbm [shape: f32[8,2,32], index: 4, kind: output, shape index: {}]  }
   0x1   :  { %11 = vsyncpa [#allocation6], 0  ;;  %s408_s15 = smov [#allocation4]   ;;  %s360_s19 = scalar_lea.hbm %s577_s1, 256 }
   0x2   :  { %s17_s16 = sshll.u32 %s408_s15, 4  ;;  %p361_p0 = scmp.ne.s32.totalorder %s577_s1, %s360_s19  ;;  %s18_s16 = int_to_ptr.vmem [resolvable:$true] %s17_s16 }
   0x3   :  { %p364_p1 = scmp.lt.u32.totalorder %s360_s19, %s577_s1 }
   0x5   :  { %p366_p2 = pnand %p364_p1, %p361_p0 }
   0x7   :  { %369 = shalt.err (!%p366_p2)
}
   0x8   :  { %s370_s24 = scalar_lea.vmem %s18_s16, 256  ;;  %p375_p4 = scmp.lt.s32.totalorder %s18_s16, %s18_s16 }
   0x9   :  { %p371_p3 = scmp.ne.s32.totalorder %s18_s16, %s370_s24  ;;  %p376_p5 = scmp.lt.s32.totalorder %s370_s24, %s370_s24 }
   0xb   :  { %p377_p6 = por %p376_p5, %p375_p4 }
   0xd   :  { %p378_p7 = pnand %p377_p6, %p371_p3 }
   0xf   :  { %381 = shalt.err (!%p378_p7)
}
  0x10   :  { %s409_s25 = smov 32   ;;  %s410_s26 = smov 2  }
  0x11   :  { %23 = dma.hbm_to_vmem [thread:$0]  %s577_s1, 256, %s18_s16, [#allocation5], %s409_s25, %s409_s25, %s410_s26  }
  0x12   :  { %404 = dma.done.wait [#allocation5], 256  }
  0x13   :  { %405 = vsyncadd [#allocation5], 4294967040  ;;  %v114_v0 = vlaneseq  ;;  %v411_v1 = vmov 0   ;;  %v120_v4 = vld [vmem:[%s579_s3 + $0x2] sm:$0x1]  ;;  %vm319_vm0 = vcmask 254976  }
  0x14   :  { %359 = vset.pattern.permute.xlu1 %v411_v1  ;;  %358 = vset.pattern.permute.xlu0 %v411_v1  ;;  %v118_v5 = vld [vmem:[%s579_s3] sm:$0x1]  ;;  %v121_v6 = vld [vmem:[%s579_s3 + $0x3] sm:$0x1]  ;;  %v128_v7 = vmul.u32 2, %v120_v4 }
  0x15   :  { %v453_v2 = vshrl.u32 %v114_v0, 7  ;;  %v126_v8 = vmul.u32 2, %v118_v5  ;;  %v119_v9 = vld [vmem:[%s579_s3 + $0x1] sm:$0x1]  ;;  %v129_v10 = vmul.u32 2, %v121_v6  ;;  %v483_v28 = vand.u32 127, %v114_v0 }
  0x16   :  { %v127_v11 = vmul.u32 2, %v119_v9  ;;  %v123_v12 = vld [vmem:[%s579_s3 + $0x5] sm:$0x1]  ;;  %v122_v13 = vld [vmem:[%s579_s3 + $0x4] sm:$0x1] }
  0x17   :  { %v136_v3 = vsub.s32 0, %v453_v2  ;;  %v131_v18 = vmul.u32 2, %v123_v12  ;;  %v130_v19 = vmul.u32 2, %v122_v13  ;;  %v125_v20 = vld [vmem:[%s579_s3 + $0x7] sm:$0x1] }
  0x18   :  { %v124_v21 = vld [vmem:[%s579_s3 + $0x6] sm:$0x1]  ;;  %v133_v24 = vmul.u32 2, %v125_v20  ;;  %s104_s20 = smul.u32 2654435761, %s576_s0 }
  0x19   :  { %v145_v14 = vrot.slane %v128_v7, %v136_v3  ;;  %v137_v15 = vrot.slane %v126_v8, %v136_v3  ;;  %v149_v16 = vrot.slane %v129_v10, %v136_v3  ;;  %v141_v17 = vrot.slane %v127_v11, %v136_v3  ;;  %v33_v30 = vld [vmem:[#allocation4 + $0x4] sm:$0x3]  ;;  %v347_v32 = vld [vmem:[%s578_s2 + $0x2] ss:$0 sm:$0xff]  ;;  %v31_v34 = vld [vmem:[#allocation4] sm:$0x3] }
  0x1a   :  { %v157_v22 = vrot.slane %v131_v18, %v136_v3  ;;  %v153_v23 = vrot.slane %v130_v19, %v136_v3  ;;  %v132_v25 = vmul.u32 2, %v124_v21  ;;  %v165_v26 = vrot.slane %v133_v24, %v136_v3  ;;  %s105_s21 = sadd.s32 2246822519, %s104_s20  ;;  %v345_v35 = vld [vmem:[%s578_s2] ss:$0 sm:$0xff] }
  0x1b   :  { %173 = vperm.xlu1 %359, %v145_v14   ;;  %167 = vperm.xlu0 %358, %v137_v15   ;;  %s106_s22 = sshrl.u32 %s105_s21, 16  ;;  %v34_v37 = vld [vmem:[#allocation4 + $0x6] sm:$0x3]  ;;  %v348_v38 = vld [vmem:[%s578_s2 + $0x3] ss:$0 sm:$0xff]  ;;  %v97_v44 = vadd.f32 %v347_v32, %v33_v30  ;;  %v95_v45 = vadd.f32 %v345_v35, %v31_v34 }
  0x1c   :  { %v161_v27 = vrot.slane %v132_v25, %v136_v3  ;;  %s107_s23 = sxor.u32 %s106_s22, %s105_s21  ;;  %v32_v41 = vld [vmem:[#allocation4 + $0x2] sm:$0x3]  ;;  %v346_v42 = vld [vmem:[%s578_s2 + $0x1] ss:$0 sm:$0xff]  ;;  %v36_v52 = vld [vmem:[#allocation4 + $0xa] sm:$0x3]  ;;  %v98_v54 = vadd.f32 %v348_v38, %v34_v37 }
  0x1d   :  { %s108_s3 = smul.u32 2246822507, %s107_s23  ;;  %v350_v53 = vld [vmem:[%s578_s2 + $0x5] ss:$0 sm:$0xff]  ;;  %v96_v55 = vadd.f32 %v346_v42, %v32_v41  ;;  %v510_v60 = vmul.f32 1.1111112, %v97_v44 }
  0x1e   :  { %v512_v61 = vmul.f32 1.1111112, %v95_v45  ;;  %v100_v63 = vadd.f32 %v350_v53, %v36_v52  ;;  %v35_v6 = vld [vmem:[#allocation4 + $0x8] sm:$0x3]  ;;  %v349_v7 = vld [vmem:[%s578_s2 + $0x4] ss:$0 sm:$0xff] }
  0x1f   :  { %176 = vperm.xlu1 %359, %v149_v16   ;;  %170 = vperm.xlu0 %358, %v141_v17   ;;  %s109_s24 = sshrl.u32 %s108_s3, 13  ;;  %v519_v8 = vmul.f32 1.1111112, %v98_v54  ;;  %v521_v9 = vmul.f32 1.1111112, %v96_v55  ;;  %v529_v18 = vadd.f32 %v349_v7, %v35_v6 }
  0x20   :  { %s110_s27 = sxor.u32 %s109_s24, %s108_s3  ;;  %v527_v17 = vmul.f32 1.1111112, %v100_v63 }
  0x21   :  { %s111_s28 = smul.u32 3266489909, %s110_s27 }
  0x23   :  { %182 = vperm.xlu1 %359, %v157_v22   ;;  %179 = vperm.xlu0 %358, %v153_v23   ;;  %s112_s29 = sshrl.u32 %s111_s28, 16 }
  0x24   :  { %s113_s30 = sxor.u32 %s112_s29, %s111_s28 }
  0x25   :  { %v499_v43 = vstv %s113_s30 }
  0x27   :  { %188 = vperm.xlu1 %359, %v165_v26   ;;  %185 = vperm.xlu0 %358, %v161_v27  }
  0x9a   :  { %v174_v29 = vpop.permute.xlu1 %173  ;;  %v168_v31 = vpop.permute.xlu0 %167 }
  0x9b   :  { %v192_v33 = vadd.s32 %v174_v29, %v453_v2  ;;  %v190_v36 = vadd.s32 %v168_v31, %v453_v2 }
  0x9d   :  { %v200_v39 = vmul.u32 32, %v192_v33  ;;  %v198_v40 = vmul.u32 32, %v190_v36 }
  0x9e   :  { %v177_v46 = vpop.permute.xlu1 %176  ;;  %v171_v47 = vpop.permute.xlu0 %170 }
  0x9f   :  { %v208_v48 = vadd.s32 %v200_v39, %v483_v28  ;;  %v206_v49 = vadd.s32 %v198_v40, %v483_v28  ;;  %v193_v50 = vadd.s32 %v177_v46, %v453_v2  ;;  %v191_v51 = vadd.s32 %v171_v47, %v453_v2 }
  0xa1   :  { %v217_v56 = vxor.u32 %v499_v43, %v208_v48  ;;  %v215_v57 = vxor.u32 %v499_v43, %v206_v49  ;;  %v201_v58 = vmul.u32 32, %v193_v50  ;;  %v199_v59 = vmul.u32 32, %v191_v51 }
  0xa2   :  { %v183_v62 = vpop.permute.xlu1 %182  ;;  %v180_v0 = vpop.permute.xlu0 %179 }
  0xa3   :  { %v225_v1 = vshrl.u32 %v217_v56, 16  ;;  %v223_v3 = vshrl.u32 %v215_v57, 16  ;;  %v209_v4 = vadd.s32 %v201_v58, %v483_v28  ;;  %v207_v5 = vadd.s32 %v199_v59, %v483_v28 }
  0xa4   :  { %v195_v10 = vadd.s32 %v183_v62, %v453_v2  ;;  %v194_v11 = vadd.s32 %v180_v0, %v453_v2 }
  0xa5   :  { %v233_v12 = vxor.u32 %v225_v1, %v217_v56  ;;  %v231_v13 = vxor.u32 %v223_v3, %v215_v57  ;;  %v218_v14 = vxor.u32 %v499_v43, %v209_v4  ;;  %v216_v15 = vxor.u32 %v499_v43, %v207_v5 }
  0xa6   :  { %v203_v16 = vmul.u32 32, %v195_v10  ;;  %v202_v19 = vmul.u32 32, %v194_v11  ;;  %v189_v20 = vpop.permute.xlu1 %188  ;;  %v186_v21 = vpop.permute.xlu0 %185 }
  0xa7   :  { %v241_v22 = vmul.u32 2246822507, %v233_v12  ;;  %v239_v23 = vmul.u32 2246822507, %v231_v13  ;;  %v226_v24 = vshrl.u32 %v218_v14, 16  ;;  %v224_v25 = vshrl.u32 %v216_v15, 16 }
  0xa8   :  { %v211_v26 = vadd.s32 %v203_v16, %v483_v28  ;;  %v210_v27 = vadd.s32 %v202_v19, %v483_v28  ;;  %v197_v29 = vadd.s32 %v189_v20, %v453_v2  ;;  %v196_v30 = vadd.s32 %v186_v21, %v453_v2 }
  0xa9   :  { %v249_v31 = vshrl.u32 %v241_v22, 13  ;;  %v247_v32 = vshrl.u32 %v239_v23, 13  ;;  %v234_v33 = vxor.u32 %v226_v24, %v218_v14  ;;  %v232_v34 = vxor.u32 %v224_v25, %v216_v15 }
  0xaa   :  { %v220_v35 = vxor.u32 %v499_v43, %v211_v26  ;;  %v219_v36 = vxor.u32 %v499_v43, %v210_v27  ;;  %v205_v37 = vmul.u32 32, %v197_v29  ;;  %v204_v38 = vmul.u32 32, %v196_v30  ;;  %v38_v29 = vld [vmem:[#allocation4 + $0xe] sm:$0x3] }
  0xab   :  { %v257_v39 = vxor.u32 %v249_v31, %v241_v22  ;;  %v255_v40 = vxor.u32 %v247_v32, %v239_v23  ;;  %v242_v41 = vmul.u32 2246822507, %v234_v33  ;;  %v240_v42 = vmul.u32 2246822507, %v232_v34  ;;  %v352_v34 = vld [vmem:[%s578_s2 + $0x7] ss:$0 sm:$0xff] }
  0xac   :  { %v228_v44 = vshrl.u32 %v220_v35, 16  ;;  %v227_v45 = vshrl.u32 %v219_v36, 16  ;;  %v213_v46 = vadd.s32 %v205_v37, %v483_v28  ;;  %v212_v2 = vadd.s32 %v204_v38, %v483_v28 }
  0xad   :  { %v265_v47 = vmul.u32 3266489909, %v257_v39  ;;  %v263_v48 = vmul.u32 3266489909, %v255_v40  ;;  %v250_v49 = vshrl.u32 %v242_v41, 13  ;;  %v248_v50 = vshrl.u32 %v240_v42, 13 }
  0xae   :  { %v236_v51 = vxor.u32 %v228_v44, %v220_v35  ;;  %v235_v52 = vxor.u32 %v227_v45, %v219_v36  ;;  %v222_v53 = vxor.u32 %v499_v43, %v213_v46  ;;  %v221_v54 = vxor.u32 %v499_v43, %v212_v2  ;;  %v351_v35 = vld [vmem:[%s578_s2 + $0x6] ss:$0 sm:$0xff]  ;;  %s412_s2 = smov [#allocation7]  }
  0xaf   :  { %v273_v55 = vshrl.u32 %v265_v47, 16  ;;  %v271_v56 = vshrl.u32 %v263_v48, 16  ;;  %v258_v57 = vxor.u32 %v250_v49, %v242_v41  ;;  %v256_v58 = vxor.u32 %v248_v50, %v240_v42  ;;  %s333_s19 = sshll.u32 %s412_s2, 4  ;;  %s334_s19 = int_to_ptr.vmem [resolvable:$true] %s333_s19 }
  0xb0   :  { %v244_v59 = vmul.u32 2246822507, %v236_v51  ;;  %v243_v62 = vmul.u32 2246822507, %v235_v52  ;;  %v230_v63 = vshrl.u32 %v222_v53, 16  ;;  %v229_v0 = vshrl.u32 %v221_v54, 16  ;;  %p387_p9 = scmp.lt.s32.totalorder %s334_s19, %s334_s19 }
  0xb1   :  { %v281_v1 = vxor.u32 %v273_v55, %v265_v47  ;;  %v279_v28 = vxor.u32 %v271_v56, %v263_v48  ;;  %v266_v3 = vmul.u32 3266489909, %v258_v57  ;;  %v264_v4 = vmul.u32 3266489909, %v256_v58  ;;  %s382_s20 = scalar_lea.vmem %s334_s19, 256 }
  0xb2   :  { %v252_v5 = vshrl.u32 %v244_v59, 13  ;;  %v251_v6 = vshrl.u32 %v243_v62, 13  ;;  %v238_v7 = vxor.u32 %v230_v63, %v222_v53  ;;  %v237_v10 = vxor.u32 %v229_v0, %v221_v54  ;;  %p383_p8 = scmp.ne.s32.totalorder %s334_s19, %s382_s20  ;;  %p388_p10 = scmp.lt.s32.totalorder %s382_s20, %s382_s20 }
  0xb3   :  { %v289_v11 = vand.u32 2147483647, %v281_v1  ;;  %v287_v12 = vand.u32 2147483647, %v279_v28  ;;  %v274_v13 = vshrl.u32 %v266_v3, 16  ;;  %v272_v43 = vshrl.u32 %v264_v4, 16 }
  0xb4   :  { %v260_v14 = vxor.u32 %v252_v5, %v244_v59  ;;  %v259_v15 = vxor.u32 %v251_v6, %v243_v62  ;;  %v246_v16 = vmul.u32 2246822507, %v238_v7  ;;  %v245_v19 = vmul.u32 2246822507, %v237_v10  ;;  %p389_p11 = por %p388_p10, %p387_p9 }
  0xb5   :  { %vm297_vm1 = vcmp.ge.s32.totalorder %v289_v11, 214748365  ;;  %vm295_vm2 = vcmp.ge.s32.totalorder %v287_v12, 214748365  ;;  %v282_v20 = vxor.u32 %v274_v13, %v266_v3  ;;  %v280_v21 = vxor.u32 %v272_v43, %v264_v4 }
  0xb6   :  { %v313_v22 = vsel %vm297_vm1, %v510_v60, 0.0  ;;  %v311_v23 = vsel %vm295_vm2, %v512_v61, 0.0  ;;  %v268_v24 = vmul.u32 3266489909, %v260_v14  ;;  %v267_v25 = vmul.u32 3266489909, %v259_v15  ;;  %p390_p12 = pnand %p389_p11, %p383_p8 }
  0xb7   :  { %322 = vst.msk [vmem:[#allocation7 + $0x4] sm:$0x3] %vm319_vm0, %v313_v22  ;;  %320 = vst.msk [vmem:[#allocation7] sm:$0x3] %vm319_vm0, %v311_v23  ;;  %v290_v26 = vand.u32 2147483647, %v282_v20  ;;  %v102_v2 = vadd.f32 %v352_v34, %v38_v29 }
  0xb8   :  { %v288_v27 = vand.u32 2147483647, %v280_v21  ;;  %v254_v30 = vshrl.u32 %v246_v16, 13  ;;  %v253_v31 = vshrl.u32 %v245_v19, 13  ;;  %v276_v32 = vshrl.u32 %v268_v24, 16 }
  0xb9   :  { %v275_v33 = vshrl.u32 %v267_v25, 16  ;;  %v37_v60 = vld [vmem:[#allocation4 + $0xc] sm:$0x3]  ;;  %vm298_vm3 = vcmp.ge.s32.totalorder %v290_v26, 214748365 }
  0xba   :  { %vm296_vm4 = vcmp.ge.s32.totalorder %v288_v27, 214748365  ;;  %v262_v61 = vxor.u32 %v254_v30, %v246_v16  ;;  %v261_v36 = vxor.u32 %v253_v31, %v245_v19  ;;  %v314_v37 = vsel %vm298_vm3, %v519_v8, 0.0 }
  0xbb   :  { %v312_v38 = vsel %vm296_vm4, %v521_v9, 0.0  ;;  %v284_v39 = vxor.u32 %v276_v32, %v268_v24  ;;  %v283_v40 = vxor.u32 %v275_v33, %v267_v25  ;;  %323 = vst.msk [vmem:[#allocation7 + $0x6] sm:$0x3] %vm319_vm0, %v314_v37  ;;  %v307_v41 = vmul.f32 1.1111112, %v529_v18 }
  0xbc   :  { %321 = vst.msk [vmem:[#allocation7 + $0x2] sm:$0x3] %vm319_vm0, %v312_v38  ;;  %v270_v42 = vmul.u32 3266489909, %v262_v61  ;;  %v269_v44 = vmul.u32 3266489909, %v261_v36  ;;  %v101_v47 = vadd.f32 %v351_v35, %v37_v60 }
  0xbd   :  { %v292_v45 = vand.u32 2147483647, %v284_v39  ;;  %v291_v46 = vand.u32 2147483647, %v283_v40  ;;  %v310_v18 = vmul.f32 1.1111112, %v102_v2 }
  0xbe   :  { %v278_v48 = vshrl.u32 %v270_v42, 16  ;;  %v277_v49 = vshrl.u32 %v269_v44, 16  ;;  %v309_v52 = vmul.f32 1.1111112, %v101_v47 }
  0xbf   :  { %vm300_vm5 = vcmp.ge.s32.totalorder %v292_v45, 214748365  ;;  %vm299_vm6 = vcmp.ge.s32.totalorder %v291_v46, 214748365 }
  0xc0   :  { %v316_v8 = vsel %vm300_vm5, %v527_v17, 0.0  ;;  %v315_v9 = vsel %vm299_vm6, %v307_v41, 0.0  ;;  %v286_v50 = vxor.u32 %v278_v48, %v270_v42  ;;  %v285_v51 = vxor.u32 %v277_v49, %v269_v44 }
  0xc1   :  { %325 = vst.msk [vmem:[#allocation7 + $0xa] sm:$0x3] %vm319_vm0, %v316_v8  ;;  %324 = vst.msk [vmem:[#allocation7 + $0x8] sm:$0x3] %vm319_vm0, %v315_v9 }
  0xc2   :  { %v294_v53 = vand.u32 2147483647, %v286_v50  ;;  %v293_v54 = vand.u32 2147483647, %v285_v51 }
  0xc4   :  { %vm302_vm7 = vcmp.ge.s32.totalorder %v294_v53, 214748365  ;;  %vm301_vm8 = vcmp.ge.s32.totalorder %v293_v54, 214748365 }
  0xc5   :  { %v318_v55 = vsel %vm302_vm7, %v310_v18, 0.0  ;;  %v317_v56 = vsel %vm301_vm8, %v309_v52, 0.0 }
  0xc6   :  { %327 = vst.msk [vmem:[#allocation7 + $0xe] sm:$0x3] %vm319_vm0, %v318_v55  ;;  %326 = vst.msk [vmem:[#allocation7 + $0xc] sm:$0x3] %vm319_vm0, %v317_v56 }
  0xc7   :  { %393 = shalt.err (!%p390_p12)
}
  0xc8   :  { %s394_s23 = scalar_lea.hbm %s580_s4, 256 }
  0xc9   :  { %p395_p13 = scmp.ne.s32.totalorder %s580_s4, %s394_s23  ;;  %p398_p0 = scmp.lt.u32.totalorder %s394_s23, %s580_s4 }
  0xcb   :  { %p400_p1 = pnand %p398_p0, %p395_p13 }
  0xcd   :  { %403 = shalt.err (!%p400_p1)
}
  0xce   :  { %339 = dma.vmem_to_hbm [thread:$0]  %s334_s19, 256, %s580_s4, [#allocation6], %s409_s25, %s409_s25, %s410_s26  }
  0xcf   :  { %406 = dma.done.wait [#allocation6], 256  }
  0xd0   :  { %407 = vsyncadd [#allocation6], 4294967040 }
  0xd1   :  { %343 = vsyncpa [#allocation5], 1 }
  0xd2   :  { %344 = vsyncpa [#allocation6], 1 }

</bundles_post_ra>
